<compile_context>
chip_gen: v5e
topology: v5e:2x2
jax: 0.10.0
libtpu: 0.0.40
codegen_flags: <defaults>
</compile_context>

<pallas_src>
import math
import functools

import jax
import jax.numpy as jnp
from jax.experimental import pallas as pl
from jax.experimental.pallas import tpu as pltpu

_MiB = 1024 * 1024


# ----------------------------- Pallas kernel --------------------------------

def _layernorm_kernel(x_ref, g_ref, b_ref, o_ref, *, eps, h_valid):
    # x block: (tm, Hp); gamma/beta blocks: (1, Hp); out block: (tm, Hp)
    x = x_ref[...].astype(jnp.float32)
    hp = x.shape[-1]
    inv_h = jnp.float32(1.0 / h_valid)

    if h_valid != hp:
        # Hidden dim was lane-padded in the wrapper; exclude padded columns
        # from the per-row statistics.
        lane = jax.lax.broadcasted_iota(jnp.int32, x.shape, dimension=1)
        valid = lane < h_valid
        x = jnp.where(valid, x, 0.0)

    # Two-pass mean/variance in f32 (matches nn.LayerNorm numerics).
    # TODO(synk): if XLU lane-reductions ever become the exposed slot at very
    # large tiles, switch to the one-pass E[x^2]-mean^2 form (numerics caveat).
    mean = jnp.sum(x, axis=-1, keepdims=True) * inv_h
    xc = x - mean
    xc_r = jnp.where(valid, xc, 0.0) if h_valid != hp else xc
    var = jnp.sum(xc_r * xc_r, axis=-1, keepdims=True) * inv_h
    inv = jax.lax.rsqrt(var + jnp.float32(eps))       # EUP rsqrt, not a VPU divide

    g = g_ref[...].astype(jnp.float32)
    b = b_ref[...].astype(jnp.float32)
    o_ref[...] = (xc * inv * g + b).astype(o_ref.dtype)


# ------------------------------ Wrapper --------------------------------------

def _round_up(x, m):
    return ((x + m - 1) // m) * m


def _vmem_capacity_bytes():
    """Physical VMEM of the local TPU; conservative fallback if unavailable."""
    try:
        info = pltpu.get_tpu_info()
        cap = getattr(info, "vmem_capacity_bytes", None)
        if cap:
            return int(cap)
    except Exception:
        pass
    return 64 * _MiB          # conservative (v7x has 64 MiB per TC)


def _pick_row_tile(M, Hp, itemsize, budget_bytes):
    """Largest row tile whose full pipeline footprint (double-buffered in/out
    tiles + f32 temporaries) fits the budget, with dtype-aware sublane
    alignment; prefers >= 2 grid steps so work shards across TensorCores."""
    if itemsize >= 4:
        sub = 8               # f32: 8 sublanes per vreg
    elif itemsize == 2:
        sub = 16              # bf16 packs 16 sublanes
    else:
        sub = 32              # int8/fp8 pack 32 sublanes

    # Per tile-row bytes: 2x double-buffered input + 2x double-buffered output
    # (same dtype) + ~one f32 temporary of the block for the upcast/intermediates.
    per_row = (4 * itemsize + 4) * Hp
    cap = max(sub, budget_bytes // per_row)

    candidates = (2048, 1024, 512, 256, 128, 64, 32, 16, 8)
    fitting = [t for t in candidates if t % sub == 0 and t <= cap]
    if not fitting:
        fitting = [sub]

    # Largest fitting tile that still yields >= 2 grid steps (megacore on v7x,
    # DMA/compute overlap everywhere).
    for tm in fitting:
        if pl.cdiv(M, tm) >= 2:
            return tm
    # M fits in a single (small) tile: take the smallest fitting tile covering it.
    return fitting[-1]


def pallas_layer_norm(x, gamma, beta, eps=1e-5):
    """LayerNorm over the last dim of x (any leading shape) via a Pallas TPU kernel."""
    orig_shape = x.shape
    H = orig_shape[-1]
    M = math.prod(orig_shape[:-1])

    x2d = x.reshape(M, H)
    g2d = gamma.reshape(1, H)
    b2d = beta.reshape(1, H)

    # Lane-dense output: pad hidden dim to a multiple of 128 if needed.
    Hp = max(128, _round_up(H, 128))
    if Hp != H:
        pad = Hp - H
        x2d = jnp.pad(x2d, ((0, 0), (0, pad)))
        g2d = jnp.pad(g2d, ((0, 0), (0, pad)))
        b2d = jnp.pad(b2d, ((0, 0), (0, pad)))

    itemsize = jnp.dtype(x.dtype).itemsize
    phys_vmem = _vmem_capacity_bytes()
    budget = min(phys_vmem // 2, 28 * _MiB)        # safe on v7x's 64 MiB part
    tm = _pick_row_tile(M, Hp, itemsize, budget)
    grid = (pl.cdiv(M, tm),)                        # partial last block handled by Pallas

    # Real pipeline footprint + headroom; also lifts v5e's 16 MiB scoped default.
    footprint = (4 * itemsize + 4) * Hp * tm
    vmem_limit = int(min(phys_vmem, max(footprint + 8 * _MiB, 32 * _MiB)))

    kern = functools.partial(_layernorm_kernel, eps=eps, h_valid=H)
    out2d = pl.pallas_call(
        kern,
        out_shape=jax.ShapeDtypeStruct((M, Hp), x.dtype),
        grid=grid,
        # TODO(synk): bump x to pipeline_mode=pl.Buffered(3) only if an xprof
        # trace on v7x shows exposed input DMA at large tiles.
        in_specs=[pl.BlockSpec((tm, Hp), lambda i: (i, 0)),
                  pl.BlockSpec((1, Hp), lambda i: (0, 0)),
                  pl.BlockSpec((1, Hp), lambda i: (0, 0))],
        out_specs=pl.BlockSpec((tm, Hp), lambda i: (i, 0)),
        compiler_params=pltpu.CompilerParams(
            dimension_semantics=("parallel",),
            vmem_limit_bytes=vmem_limit),
    )(x2d, g2d, b2d)

    if Hp != H:
        out2d = out2d[:, :H]
    return out2d.reshape(orig_shape)


def norm_pipe_forward(args, params, eps=1e-5):
    """NormPipe.forward: args must be a single tensor; returns norm(args)."""
    assert not isinstance(args, tuple), \
        "NormPipe should only receive a single tensor as input"
    return pallas_layer_norm(args, params["gamma"], params["beta"], eps=eps)


# --------------------------- pure-JAX reference ------------------------------

def reference_forward(args, params, eps=1e-5):
    x = args.astype(jnp.float32)
    mean = jnp.mean(x, axis=-1, keepdims=True)
    var = jnp.mean((x - mean) ** 2, axis=-1, keepdims=True)
    y = (x - mean) / jnp.sqrt(var + eps)
    return (y * params["gamma"] + params["beta"]).astype(args.dtype)


# --------------------------------- main --------------------------------------

if __name__ == "__main__":
    SEQ, BATCH, HIDDEN = 8, 2, 32
    EPS = 1e-5

    key = jax.random.PRNGKey(0)
    k_x, k_g, k_b = jax.random.split(key, 3)

    # Megatron [s, b, h] layout, same as the surrounding transformer stack.
    hidden_states = jax.random.normal(k_x, (SEQ, BATCH, HIDDEN), jnp.float32)
    params = {
        "gamma": 1.0 + 0.1 * jax.random.normal(k_g, (HIDDEN,), jnp.float32),
        "beta": 0.1 * jax.random.normal(k_b, (HIDDEN,), jnp.float32),
    }

    out = norm_pipe_forward(hidden_states, params, eps=EPS)
    out = jax.block_until_ready(out)

    ref = reference_forward(hidden_states, params, eps=EPS)

    assert out.shape == (SEQ, BATCH, HIDDEN)
    assert jnp.allclose(out, ref, rtol=1e-5, atol=1e-5), "mismatch vs reference"

    # TODO(synk): if norm_class is RMSNorm/ScaleNorm in the NeoX config, swap the
    # in-kernel mean-subtraction for the corresponding scale-only formula.

    print("KERNEL_OK")
</pallas_src>

<mosaic_0001>
module attributes {stable_mosaic.version = 11 : i64} {
  func.func @_layernorm_kernel(%arg0: i32, %arg1: memref<8x128xf32, #tpu.memory_space<vmem>>, %arg2: memref<1x128xf32, #tpu.memory_space<vmem>>, %arg3: memref<1x128xf32, #tpu.memory_space<vmem>>, %arg4: memref<8x128xf32, #tpu.memory_space<vmem>>) attributes {dimension_semantics = [#tpu.dimension_semantics<parallel>], iteration_bounds = array<i64: 2>, scalar_prefetch = 0 : i64, scratch_operands = 0 : i64, tpu.core_type = #tpu.core_type<tc>, window_params = [{transform_indices = @transform_0, window_bounds = array<i64: 8, 128>}, {pipeline_mode = #tpu.pipeline_mode<synchronous>, transform_indices = @transform_1, window_bounds = array<i64: 1, 128>}, {pipeline_mode = #tpu.pipeline_mode<synchronous>, transform_indices = @transform_2, window_bounds = array<i64: 1, 128>}, {transform_indices = @transform_3, window_bounds = array<i64: 8, 128>}]} {
    %c0 = arith.constant 0 : index
    %c0_0 = arith.constant 0 : index
    %0 = vector.load %arg1[%c0, %c0_0] : memref<8x128xf32, #tpu.memory_space<vmem>>, vector<8x128xf32>
    %1 = tpu.iota {dimensions = array<i32: 1>} : vector<8x128xi32>
    %c32_i32 = arith.constant 32 : i32
    %2 = vector.broadcast %c32_i32 : i32 to vector<8x128xi32>
    %3 = arith.cmpi slt, %1, %2 : vector<8x128xi32>
    %cst = arith.constant 0.000000e+00 : f32
    %4 = vector.broadcast %cst : f32 to vector<8x128xf32>
    %5 = arith.select %3, %0, %4 : vector<8x128xi1>, vector<8x128xf32>
    %cst_1 = arith.constant dense<0.000000e+00> : vector<8xf32>
    %6 = vector.multi_reduction <add>, %5, %cst_1 [1] : vector<8x128xf32> to vector<8xf32>
    %7 = vector.shape_cast %6 : vector<8xf32> to vector<8x1xf32>
    %cst_2 = arith.constant 3.125000e-02 : f32
    %8 = vector.broadcast %cst_2 : f32 to vector<8x1xf32>
    %9 = arith.mulf %7, %8 : vector<8x1xf32>
    %10 = vector.broadcast %9 : vector<8x1xf32> to vector<8x128xf32>
    %11 = arith.subf %5, %10 : vector<8x128xf32>
    %cst_3 = arith.constant 0.000000e+00 : f32
    %12 = vector.broadcast %cst_3 : f32 to vector<8x128xf32>
    %13 = arith.select %3, %11, %12 : vector<8x128xi1>, vector<8x128xf32>
    %14 = arith.mulf %13, %13 : vector<8x128xf32>
    %cst_4 = arith.constant dense<0.000000e+00> : vector<8xf32>
    %15 = vector.multi_reduction <add>, %14, %cst_4 [1] : vector<8x128xf32> to vector<8xf32>
    %16 = vector.shape_cast %15 : vector<8xf32> to vector<8x1xf32>
    %cst_5 = arith.constant 3.125000e-02 : f32
    %17 = vector.broadcast %cst_5 : f32 to vector<8x1xf32>
    %18 = arith.mulf %16, %17 : vector<8x1xf32>
    %cst_6 = arith.constant 9.99999974E-6 : f32
    %19 = vector.broadcast %cst_6 : f32 to vector<8x1xf32>
    %20 = arith.addf %18, %19 : vector<8x1xf32>
    %21 = math.rsqrt %20 : vector<8x1xf32>
    %c0_7 = arith.constant 0 : index
    %c0_8 = arith.constant 0 : index
    %22 = vector.load %arg2[%c0_7, %c0_8] : memref<1x128xf32, #tpu.memory_space<vmem>>, vector<1x128xf32>
    %c0_9 = arith.constant 0 : index
    %c0_10 = arith.constant 0 : index
    %23 = vector.load %arg3[%c0_9, %c0_10] : memref<1x128xf32, #tpu.memory_space<vmem>>, vector<1x128xf32>
    %24 = vector.broadcast %21 : vector<8x1xf32> to vector<8x128xf32>
    %25 = arith.mulf %11, %24 : vector<8x128xf32>
    %26 = vector.broadcast %22 : vector<1x128xf32> to vector<8x128xf32>
    %27 = arith.mulf %25, %26 : vector<8x128xf32>
    %28 = vector.broadcast %23 : vector<1x128xf32> to vector<8x128xf32>
    %29 = arith.addf %27, %28 : vector<8x128xf32>
    %c0_11 = arith.constant 0 : index
    %c0_12 = arith.constant 0 : index
    %30 = vector.load %arg4[%c0_11, %c0_12] : memref<8x128xf32, #tpu.memory_space<vmem>>, vector<8x128xf32>
    tpu.vector_store %arg4[%c0_11, %c0_12], %29 {strides = array<i32>} : memref<8x128xf32, #tpu.memory_space<vmem>>, vector<8x128xf32>,
    return
  }
  func.func @transform_0(%arg0: i32) -> (i32, i32) {
    %c0_i32 = arith.constant 0 : i32
    %c0_i32_0 = arith.constant 0 : i32
    return %arg0, %c0_i32 : i32, i32
  }
  func.func @transform_1(%arg0: i32) -> (i32, i32) {
    %c0_i32 = arith.constant 0 : i32
    %c0_i32_0 = arith.constant 0 : i32
    %c0_i32_1 = arith.constant 0 : i32
    return %c0_i32, %c0_i32_0 : i32, i32
  }
  func.func @transform_2(%arg0: i32) -> (i32, i32) {
    %c0_i32 = arith.constant 0 : i32
    %c0_i32_0 = arith.constant 0 : i32
    %c0_i32_1 = arith.constant 0 : i32
    return %c0_i32, %c0_i32_0 : i32, i32
  }
  func.func @transform_3(%arg0: i32) -> (i32, i32) {
    %c0_i32 = arith.constant 0 : i32
    %c0_i32_0 = arith.constant 0 : i32
    return %arg0, %c0_i32 : i32, i32
  }
}

</mosaic_0001>

<bundles_post_ra>
// kernel: tpu_custom_call.1
= control target key start
LH: loop header
LB: loop body
LE: loop exit
PB: predicated region body
PF: predicated region fallthrough
CT: control target
= control target key end

     0   :  { %8 = vsyncpa [#allocation3], 0  ;;  %s709_s0 = inlined_call_operand.hbm [shape: f32[16,128], index: 0, kind: input, shape index: {}]   ;;  %s710_s1 = inlined_call_operand.hbm [shape: f32[1,128], index: 1, kind: input, shape index: {}]   ;;  %s711_s2 = inlined_call_operand.vmem [shape: f32[1,128], index: 2, kind: input, shape index: {}]   ;;  %s712_s3 = inlined_call_operand.hbm [shape: f32[16,128], index: 3, kind: output, shape index: {}]  }
   0x1   :  { %10 = vsyncpa [#allocation3 + $0x1], 0 }
   0x2   :  { %11 = vsyncpa [#allocation6], 0 }
   0x3   :  { %12 = vsyncpa [#allocation4], 0 }
   0x4   :  { %14 = vsyncpa [#allocation4 + $0x1], 0  ;;  %s564_s12 = smov 0   ;;  %s566_s13 = smov 0  }
   0x5   :  { %s568_s14 = smov 0   ;;  %s570_s15 = smov 0  }
   0x6 LB: > { %s585_s16 = sadd.s32 4294967295, %s541_s15   ;;  %s336_s17 = sadd.s32 4294967294, %s541_s15   ;;  %s541_s15 = sphi %s570_s15, %s722_s15   ;;  %s537_s14 = sphi %s568_s14, %s721_s14   ;;  %s533_s13 = sphi %s566_s13, %s720_s13   ;;  %s529_s12 = sphi %s564_s12, %s719_s12  }
   0x7   : > { %p40_p0 = scmp.ne.s32.totalorder %s533_s13, %s529_s12  ;;  %p41_p1 = scmp.eq.s32.totalorder %s585_s16, 0 }
   0x8   : > { %p106_p2 = scmp.eq.s32.totalorder %s585_s16, 1  ;;  %p112_p3 = scmp.eq.s32.totalorder %s336_s17, 1 }
   0x9   : > { %p594_p4 = por %p41_p1, %p40_p0  ;;  %p337_p5 = scmp.ge.s32.totalorder %s541_s15, 1 }
   0xa   : > { %p599_p6 = por %p112_p3, %p40_p0  ;;  %p119_p7 = scmp.lt.s32.totalorder %s541_s15, 3 }
   0xb   : > { %s131_s22 = sshll.u32 %s710_s1, 4  ;;  %s543_s24 = smov [#allocation5]   ;;  %s132_s22 = int_to_ptr.hbm [resolvable:$true] %s131_s22 }
   0xc   : > { %p607_p8 = pnand %p337_p5, %p119_p7  ;;  %s133_s25 = sshll.u32 %s543_s24, 4  ;;  %s134_s25 = int_to_ptr.vmem [resolvable:$true] %s133_s25 }
   0xd   : > { %s617_s26 = sadd.s32 1, %s541_s15   ;;  %s27_s27 = sadd.s32 1, %s537_s14 }
   0xe   : > { %p358_p10 = pneg %p607_p8  ;;  %s24_s28 = ssub.s32 %s541_s15, %s617_s26 }
   0xf   : > { %p25_p12 = scmp.eq.s32.totalorder %s24_s28, 0  ;;  %p34_p13 = scmp.ne.s32.totalorder %s537_s14, %s533_s13 }
  0x10   : > { %p359_p11 = pnand %p358_p10, %p41_p1  ;;  %p35_p0 = scmp.eq.s32.totalorder %s541_s15, 0 }
  0x11   : > { %s626_s29 = scalar_select %p25_p12, %s537_s14, %s27_s27  }
  0x12   : > { %361 = dma.hbm_to_vmem [thread:$0]  (!%p359_p11), %s132_s22, 16, %s134_s25, [#allocation6]  }
  0x13   : > { %p630_p3 = por %p106_p2, %p34_p13  ;;  %p371_p5 = scmp.lt.s32.totalorder %s541_s15, 2 }
  0x14   : > { %s147_s4 = sand.u32 1, %s537_s14   ;;  %s341_s5 = sshll.u32 %s541_s15, 3 }
  0x15   : > { %p36_p7 = por %p35_p0, %p34_p13  ;;  %s340_s6 = sshll.u32 %s147_s4, 3 }
  0x16   : > { %s155_s9 = scalar_lea.hbm %s709_s0, %s341_s5  ;;  %s151_s11 = scalar_lea.vmem [#allocation2], %s340_s6 }
  0x17   : > { %s157_s10 = sshll.u32 %s155_s9, 4  ;;  %s159_s17 = sshll.u32 %s151_s11, 4  ;;  %s158_s10 = int_to_ptr.hbm [resolvable:$true] %s157_s10  ;;  %s160_s17 = int_to_ptr.vmem [resolvable:$true] %s159_s17 }
  0x18   : > { %p640_p10 = pnand %p371_p5, %p36_p7  ;;  %s148_s21 = scalar_lea.sflag [#allocation3], %s147_s4 }
  0x19   : > { %s441_s22 = sshra.s32 %s158_s10, 4  ;;  %s448_s28 = scalar_lea.hbm %s709_s0, 16  ;;  %s442_s22 = int_to_ptr.hbm [resolvable:$true] %s441_s22 }
  0x1a   : > { %s443_s24 = scalar_lea.hbm %s442_s22, 8  ;;  %p445_p11 = pneg %p640_p10 }
  0x1b   : > { %p444_p2 = scmp.ne.s32.totalorder %s442_s22, %s443_s24  ;;  %p449_p0 = scmp.lt.s32.totalorder %s442_s22, %s709_s0 }
  0x1c   : > { %p450_p5 = scmp.lt.s32.totalorder %s448_s28, %s443_s24 }
  0x1d   : > { %p446_p12 = pnand %p445_p11, %p444_p2 }
  0x1e   : > { %p451_p7 = por %p450_p5, %p449_p0 }
  0x1f   : > { %p447_p13 = pneg %p446_p12 }
  0x21   : > { %p452_p9 = pnand %p451_p7, %p447_p13 }
  0x23   : > { %455 = shalt.err (!%p452_p9)
}
  0x24   : > { %365 = dma.hbm_to_vmem [thread:$0]  (!%p640_p10), %s158_s10, 128, %s160_s17, %s148_s21  }
  0x25   : > { %168 = sbr.rel (%p607_p8) target bundleno = 321 (0x141), region = 32  ;;  %s657_s4 = sand.u32 (!%p607_p8), 1, %s533_s13  }
  0x26   : > { %s343_s7 = sshll.u32 (!%p607_p8), %s657_s4, 3  ;;  %s171_s8 = scalar_lea.sflag (!%p607_p8), [#allocation3], %s657_s4 }
  0x27   : > { %s174_s9 = scalar_lea.vmem (!%p607_p8), [#allocation2], %s343_s7 }
  0x2a   : > { %516 = dma.done.wait (%p594_p4), %s171_s8, 128  }
  0x2b   : > { %518 = vsyncadd (%p594_p4), %s171_s8, 4294967168 }
  0x2c   : > { %520 = dma.done.wait (%p41_p1), [#allocation6], 16  }
  0x2d   : > { %522 = vsyncadd (%p41_p1), [#allocation6], 4294967280  ;;  %v204_v0 = vlaneseq  ;;  %v203_v2 = vld [vmem:[%s174_s9] sm:$0xff]  ;;  %s347_s18 = sshll.u32 %s585_s16, 3  ;;  %v407_v18 = vld [vmem:[#allocation5] ss:$0 sm:$0xff] }
  0x2e   : > { %s251_s11 = scalar_lea.hbm %s712_s3, %s347_s18  ;;  %v408_v21 = vld [vmem:[%s711_s2] ss:$0 sm:$0xff]  ;;  %s202_s21 = scalar_lea.vmem [#allocation7], %s343_s7 }
  0x2f   : > { %v205_v1 = vand.u32 127, %v204_v0  ;;  %s253_s22 = sshll.u32 %s202_s21, 4  ;;  %s255_s16 = sshll.u32 %s251_s11, 4  ;;  %s254_s22 = int_to_ptr.vmem [resolvable:$true] %s253_s22  ;;  %s256_s16 = int_to_ptr.hbm [resolvable:$true] %s255_s16 }
  0x30   : > { %s241_s24 = scalar_lea.sflag [#allocation4], %s657_s4  ;;  %s485_s25 = sshra.s32 %s256_s16, 4  ;;  %s486_s25 = int_to_ptr.hbm [resolvable:$true] %s485_s25 }
  0x31   : > { %vm206_vm0 = vcmp.lt.s32.totalorder %v205_v1, 32  ;;  %s487_s27 = scalar_lea.hbm %s486_s25, 8  ;;  %s491_s6 = scalar_lea.hbm %s712_s3, 16 }
  0x32   : > { %v207_v3 = vsel %vm206_vm0, %v203_v2, 0.0  ;;  %p488_p1 = scmp.ne.s32.totalorder %s486_s25, %s487_s27  ;;  %p492_p9 = scmp.lt.s32.totalorder %s486_s25, %s712_s3 }
  0x33   : > { %208 = vadd.xlane.f32.xlu0 %v207_v3  ;;  %p493_p10 = scmp.lt.s32.totalorder %s491_s6, %s487_s27 }
  0x34   : > { %p489_p4 = pnand %p488_p1, %p630_p3 }
  0x35   : > { %p494_p2 = por %p493_p10, %p492_p9 }
  0x36   : > { %p490_p8 = pneg %p489_p4 }
  0x38   : > { %p495_p11 = pnand %p494_p2, %p490_p8 }
  0xa6   : > { %v209_v4 = vpop.xlane.xlu0 %208 }
  0xa7   : > { %v210_v5 = vmul.f32 0.03125, %v209_v4 }
  0xa9   : > { %v211_v6 = vsub.f32 %v207_v3, %v210_v5 }
  0xab   : > { %v212_v7 = vsel %vm206_vm0, %v211_v6, 0.0 }
  0xac   : > { %v213_v8 = vmul.f32 %v212_v7, %v212_v7 }
  0xae   : > { %214 = vadd.xlane.f32.xlu0 %v213_v8 }
 0x121   : > { %v215_v9 = vpop.xlane.xlu0 %214 }
 0x122   : > { %v216_v10 = vmul.f32 0.03125, %v215_v9 }
 0x124   : > { %v217_v11 = vadd.f32 1e-05, %v216_v10 }
 0x126   : > { %409 = vrsqrt.f32 %v217_v11  ;;  %vm224_vm2 = vweird.f32 %v217_v11 }
 0x12c   : > { %v410_v12 = vpop.eup %409 }
 0x12d   : > { %v219_v13 = vmul.f32 %v410_v12, %v217_v11  ;;  %vm225_vm1 = vweird.f32 %v410_v12 }
 0x12e   : > { %vm226_vm3 = vmor %vm224_vm2, %vm225_vm1 }
 0x12f   : > { %v220_v14 = vmul.f32 %v410_v12, %v219_v13 }
 0x131   : > { %v221_v15 = vmul.f32 0.5, %v220_v14 }
 0x133   : > { %v222_v16 = vsub.f32 1.5, %v221_v15 }
 0x135   : > { %v223_v17 = vmul.f32 %v410_v12, %v222_v16 }
 0x137   : > { %v227_v19 = vsel %vm226_vm3, %v410_v12, %v223_v17 }
 0x138   : > { %v230_v20 = vmul.f32 %v227_v19, %v211_v6 }
 0x13a   : > { %v234_v22 = vmul.f32 %v407_v18, %v230_v20 }
 0x13c   : > { %v238_v23 = vadd.f32 %v408_v21, %v234_v22 }
 0x13e   : > { %239 = vst [vmem:[%s202_s21] sm:$0xff] %v238_v23 }
 0x13f   : > { %498 = shalt.err (!%p495_p11)
}
 0x140   : > { %356 = dma.vmem_to_hbm [thread:$0]  (%p630_p3), %s254_s22, 128, %s256_s16, %s241_s24  }
 0x141 PF: > { %s267_s4 = sand.u32 1, %s529_s12   ;;  %p718_p12 = scmp.ge.s32.totalorder %s541_s15, 2 }
 0x142   : > { %s268_s9 = scalar_lea.sflag [#allocation4], %s267_s4 }
 0x143   : > { %p367_p13 = pnand %p718_p12, %p599_p6 }
 0x145   : > { %p368_p0 = pneg %p367_p13 }
 0x147   : > { %524 = dma.done.wait (%p368_p0), %s268_s9, 128  }
 0x148   : > { %526 = vsyncadd (%p368_p0), %s268_s9, 4294967168  ;;  %p17_p5 = scmp.ge.s32.totalorder %s617_s26, 4   ;;  %s719_s12 = smov %s533_s13 }
 0x149   : > { %s720_s13 = smov %s537_s14  ;;  %s721_s14 = smov %s626_s29 }
 0x14a   : > { %s722_s15 = smov %s617_s26  ;;  %19 = sbr.rel (!%p17_p5) target bundleno = 6 (0x6), region = 81 }
 0x14f   :  { %274 = vsyncpa [#allocation3], 1 }
 0x150   :  { %276 = vsyncpa [#allocation3 + $0x1], 1 }
 0x151   :  { %277 = vsyncpa [#allocation6], 1 }
 0x152   :  { %278 = vsyncpa [#allocation4], 1 }
 0x153   :  { %280 = vsyncpa [#allocation4 + $0x1], 1 }

</bundles_post_ra>
